<compile_context>
chip_gen: v5e
topology: v5e:2x2
jax: 0.10.0
libtpu: 0.0.40
codegen_flags: <defaults>
</compile_context>

<pallas_src>
import math
import functools

import jax
import jax.numpy as jnp
from jax.experimental import pallas as pl
from jax.experimental.pallas import tpu as pltpu


def _round_up(v, m):
    return (v + m - 1) // m * m


def _pick_vmem_limit_bytes():
    """Generation-aware scoped-VMEM cap (v5e/v6e: 128 MiB phys, v7x: 64 MiB)."""
    try:
        kind = jax.devices()[0].device_kind.lower()
    except Exception:
        kind = ""
    if ("v5" in kind) or ("v6" in kind):
        return 100 * 1024 * 1024
    return 48 * 1024 * 1024


# ----------------------------------------------------------------------------
# Kernel 1: support = x @ weight   (bf16 in / bf16 out, f32 MXU accumulation)
# ----------------------------------------------------------------------------
def _support_kernel(x_ref, w_ref, sup_ref):
    sup_ref[...] = jnp.dot(
        x_ref[...], w_ref[...], preferred_element_type=jnp.float32
    ).astype(sup_ref.dtype)


# ----------------------------------------------------------------------------
# Kernel 2: out = relu(adj @ support + bias [+ residual])
#   grid = (row tiles, k tiles); k = adj reduction axis (innermost, "arbitrary").
#   The f32 output block IS the accumulator (resident across k).  k==0 seeds it
#   with bias (+ residual), k==last applies relu in place.
# ----------------------------------------------------------------------------
def _make_gcn_kernel(identity, resident, tk):
    def body(adj_ref, sup_ref, x_ref, resw_ref, b_ref, out_ref):
        k = pl.program_id(1)

        @pl.when(k == 0)
        def _():
            if identity:
                res = x_ref[...].astype(jnp.float32)          # f32 identity residual
            else:
                res = jnp.dot(x_ref[...], resw_ref[...],       # fused Linear residual
                              preferred_element_type=jnp.float32)
            out_ref[...] = b_ref[...] + res

        if resident:
            start = pl.multiple_of(k * tk, tk)
            sup = sup_ref[pl.ds(start, tk), :]                 # slice resident support
        else:
            sup = sup_ref[...]
        out_ref[...] += jnp.dot(adj_ref[...], sup,
                                preferred_element_type=jnp.float32)

        @pl.when(k == pl.num_programs(1) - 1)
        def _():
            out_ref[...] = jnp.maximum(out_ref[...], 0.0)

    if identity:
        def kernel(adj_ref, sup_ref, x_ref, b_ref, out_ref):
            body(adj_ref, sup_ref, x_ref, None, b_ref, out_ref)
        return kernel
    return body


# ----------------------------------------------------------------------------
# Jitted forward: pad + cast (fused, inside the jit), two pallas_calls, slice back.
# ----------------------------------------------------------------------------
@functools.partial(
    jax.jit,
    static_argnames=("tm", "tk", "identity", "resident", "vmem_limit"))
def _gcn_forward(x, adj, weight, bias, proj_w, proj_b, *,
                 tm, tk, identity, resident, vmem_limit):
    n, f_in = x.shape
    f_out = weight.shape[1]
    n_p = _round_up(n, 128)
    f_in_p = _round_up(f_in, 128)
    f_out_p = _round_up(f_out, 128)

    # --- pad + cast (one fused XLA pass each; no eager HBM round-trip) ---
    xf = jnp.pad(x, ((0, n_p - n), (0, f_in_p - f_in)))                      # f32
    xb = xf.astype(jnp.bfloat16)
    adjb = jnp.pad(adj, ((0, n_p - n), (0, n_p - n))).astype(jnp.bfloat16)
    wb = jnp.pad(weight, ((0, f_in_p - f_in), (0, f_out_p - f_out))
                 ).astype(jnp.bfloat16)

    if identity:
        b_total = bias
    else:
        b_total = bias + proj_b                                              # fold Linear bias
        reswb = jnp.pad(jnp.transpose(proj_w),
                        ((0, f_in_p - f_in), (0, f_out_p - f_out))
                        ).astype(jnp.bfloat16)
    bp = jnp.pad(b_total, (0, f_out_p - f_out)).reshape(1, f_out_p)          # f32

    # --- kernel 1: support = x @ W, row-tiled ---
    support = pl.pallas_call(
        _support_kernel,
        out_shape=jax.ShapeDtypeStruct((n_p, f_out_p), jnp.bfloat16),
        grid=(n_p // tm,),
        in_specs=[pl.BlockSpec((tm, f_in_p), lambda i: (i, 0)),
                  pl.BlockSpec((f_in_p, f_out_p), lambda i: (0, 0))],
        out_specs=pl.BlockSpec((tm, f_out_p), lambda i: (i, 0)),
        compiler_params=pltpu.CompilerParams(
            dimension_semantics=("parallel",),
            vmem_limit_bytes=vmem_limit),
        cost_estimate=pl.CostEstimate(
            flops=2 * n_p * f_in_p * f_out_p,
            transcendentals=0,
            bytes_accessed=2 * (n_p * f_in_p + f_in_p * f_out_p
                                + n_p * f_out_p)),
    )(xb, wb)

    # --- kernel 2: out = relu(adj @ support + bias [+ residual]) ---
    grid = (n_p // tm, n_p // tk)
    kernel = _make_gcn_kernel(identity, resident, tk)

    adj_spec = pl.BlockSpec((tm, tk), lambda i, k: (i, k))
    if resident:
        sup_spec = pl.BlockSpec((n_p, f_out_p), lambda i, k: (0, 0))
        sup_bytes = n_p * f_out_p * 2
    else:
        sup_spec = pl.BlockSpec((tk, f_out_p), lambda i, k: (k, 0))
        sup_bytes = (n_p // tm) * n_p * f_out_p * 2
    x_spec = pl.BlockSpec((tm, f_in_p), lambda i, k: (i, 0))
    bias_spec = pl.BlockSpec((1, f_out_p), lambda i, k: (0, 0))
    out_spec = pl.BlockSpec((tm, f_out_p), lambda i, k: (i, 0))

    if identity:
        in_specs = [adj_spec, sup_spec, x_spec, bias_spec]
        args = (adjb, support, xf, bp)            # residual read in f32
        extra_flops = 0
        extra_bytes = n_p * f_in_p * 4
    else:
        resw_spec = pl.BlockSpec((f_in_p, f_out_p), lambda i, k: (0, 0))
        in_specs = [adj_spec, sup_spec, x_spec, resw_spec, bias_spec]
        args = (adjb, support, xb, reswb, bp)
        extra_flops = 2 * n_p * f_in_p * f_out_p
        extra_bytes = n_p * f_in_p * 2 + f_in_p * f_out_p * 2

    out = pl.pallas_call(
        kernel,
        out_shape=jax.ShapeDtypeStruct((n_p, f_out_p), jnp.float32),
        grid=grid,
        in_specs=in_specs,
        out_specs=out_spec,
        compiler_params=pltpu.CompilerParams(
            dimension_semantics=("parallel", "arbitrary"),
            vmem_limit_bytes=vmem_limit),
        cost_estimate=pl.CostEstimate(
            flops=2 * n_p * n_p * f_out_p + extra_flops,
            transcendentals=0,
            bytes_accessed=(2 * n_p * n_p + sup_bytes + extra_bytes
                            + 4 * f_out_p + 4 * n_p * f_out_p)),
    )(*args)
    return out[:n, :f_out]


# ----------------------------------------------------------------------------
# Public wrapper: picks tiles / residency, dispatches the jitted forward.
# ----------------------------------------------------------------------------
def graph_convolution_forward(x, adj, weight, bias, proj_w=None, proj_b=None):
    """x: (N, F_in), adj: (N, N) dense, weight: (F_in, F_out), bias: (F_out,),
    proj_w: (F_out, F_in) torch-Linear layout, proj_b: (F_out,)."""
    n, f_in = x.shape
    f_out = weight.shape[1]
    identity = (f_in == f_out)

    n_p = _round_up(n, 128)
    f_out_p = _round_up(f_out, 128)

    # Row tile: prefer 256, but keep >= 2 row tiles so v7x's two TCs both get work.
    tm = 256 if (n_p % 256 == 0 and n_p // 256 >= 2) else 128
    # Reduction tile: largest that divides n_p (fewer grid steps, near HBM roofline).
    tk = 128
    for cand in (1024, 512, 256):
        if n_p % cand == 0:
            tk = cand
            break
    # Hold support resident in VMEM when even a double-buffered copy stays small.
    resident = 2 * (n_p * f_out_p * 2) <= 16 * 1024 * 1024

    if identity:
        proj_w = None
        proj_b = None
    return _gcn_forward(x, adj, weight, bias, proj_w, proj_b,
                        tm=tm, tk=tk, identity=identity, resident=resident,
                        vmem_limit=_pick_vmem_limit_bytes())


# ----------------------------------------------------------------------------
# Pure-JAX f32 reference
# ----------------------------------------------------------------------------
def reference_forward(x, adj, weight, bias, proj_w, proj_b):
    hp = jax.lax.Precision.HIGHEST
    support = jnp.dot(x, weight, precision=hp)
    out = jnp.dot(adj, support, precision=hp) + bias
    if x.shape == out.shape:
        res = x
    else:
        res = jnp.dot(x, jnp.transpose(proj_w), precision=hp) + proj_b
    return jnp.maximum(out + res, 0.0)


# ----------------------------------------------------------------------------
# Deterministic parameter init (mirrors reset_parameters: U(-stdv, stdv))
# ----------------------------------------------------------------------------
def init_params(key, in_features, out_features):
    stdv = 1.0 / math.sqrt(out_features)
    k_w, k_b, k_pw, k_pb = jax.random.split(key, 4)
    weight = jax.random.uniform(k_w, (in_features, out_features),
                                jnp.float32, -stdv, stdv)
    bias = jax.random.uniform(k_b, (out_features,), jnp.float32, -stdv, stdv)
    # nn.Linear default init: U(-1/sqrt(fan_in), 1/sqrt(fan_in))
    p = 1.0 / math.sqrt(in_features)
    proj_w = jax.random.uniform(k_pw, (out_features, in_features),
                                jnp.float32, -p, p)
    proj_b = jax.random.uniform(k_pb, (out_features,), jnp.float32, -p, p)
    return weight, bias, proj_w, proj_b


if __name__ == "__main__":
    key = jax.random.PRNGKey(0)
    k_x, k_adj, k_p1, k_p2 = jax.random.split(key, 4)

    N = 200          # number of graph nodes (exercises row padding to 256)
    F_IN = 96        # input feature dim (exercises lane padding to 128)

    x = jax.random.normal(k_x, (N, F_IN), jnp.float32)
    # symmetric, row-normalized dense adjacency with self loops
    a = (jax.random.uniform(k_adj, (N, N), jnp.float32) > 0.9).astype(jnp.float32)
    adj = a + a.T + jnp.eye(N, dtype=jnp.float32)
    adj = adj / jnp.sum(adj, axis=1, keepdims=True)

    # bf16 inputs with f32 accumulation -> tolerance loosened vs pure-f32 reference
    ATOL = RTOL = 3e-2

    # Case 1: F_in == F_out -> identity residual branch (f32 residual add)
    w1, b1, pw1, pb1 = init_params(k_p1, F_IN, F_IN)
    out1 = graph_convolution_forward(x, adj, w1, b1, pw1, pb1)
    jax.block_until_ready(out1)
    ref1 = reference_forward(x, adj, w1, b1, pw1, pb1)
    assert out1.shape == (N, F_IN)
    assert jnp.allclose(out1, ref1, atol=ATOL, rtol=RTOL), \
        float(jnp.max(jnp.abs(out1 - ref1)))

    # Case 2: F_in != F_out -> fused projected residual (nn.Linear equivalent)
    F_OUT = 48
    w2, b2, pw2, pb2 = init_params(k_p2, F_IN, F_OUT)
    out2 = graph_convolution_forward(x, adj, w2, b2, pw2, pb2)
    jax.block_until_ready(out2)
    ref2 = reference_forward(x, adj, w2, b2, pw2, pb2)
    assert out2.shape == (N, F_OUT)
    assert jnp.allclose(out2, ref2, atol=ATOL, rtol=RTOL), \
        float(jnp.max(jnp.abs(out2 - ref2)))

    print("KERNEL_OK")
</pallas_src>

<mosaic_0001>
module attributes {stable_mosaic.version = 11 : i64} {
  func.func @_support_kernel(%arg0: i32, %arg1: memref<128x128xbf16, #tpu.memory_space<vmem>>, %arg2: memref<128x128xbf16, #tpu.memory_space<vmem>>, %arg3: memref<128x128xbf16, #tpu.memory_space<vmem>>) attributes {dimension_semantics = [#tpu.dimension_semantics<parallel>], iteration_bounds = array<i64: 2>, scalar_prefetch = 0 : i64, scratch_operands = 0 : i64, tpu.core_type = #tpu.core_type<tc>, window_params = [{transform_indices = @transform_0, window_bounds = array<i64: 128, 128>}, {pipeline_mode = #tpu.pipeline_mode<synchronous>, transform_indices = @transform_1, window_bounds = array<i64: 128, 128>}, {transform_indices = @transform_2, window_bounds = array<i64: 128, 128>}]} {
    %c0 = arith.constant 0 : index
    %c0_0 = arith.constant 0 : index
    %0 = vector.load %arg1[%c0, %c0_0] : memref<128x128xbf16, #tpu.memory_space<vmem>>, vector<128x128xbf16>
    %c0_1 = arith.constant 0 : index
    %c0_2 = arith.constant 0 : index
    %1 = vector.load %arg2[%c0_1, %c0_2] : memref<128x128xbf16, #tpu.memory_space<vmem>>, vector<128x128xbf16>
    %cst = arith.constant dense<0.000000e+00> : vector<128x128xf32>
    %2 = tpu.matmul %0, %1, %cst {dimension_numbers = #tpu.dot_dimension_numbers<[1], [0], [0], [1], [0, 0, 1, 1], [], []>} : vector<128x128xbf16>, vector<128x128xbf16>, vector<128x128xf32> -> vector<128x128xf32>
    %3 = arith.truncf %2 : vector<128x128xf32> to vector<128x128xbf16>
    %c0_3 = arith.constant 0 : index
    %c0_4 = arith.constant 0 : index
    %4 = vector.load %arg3[%c0_3, %c0_4] : memref<128x128xbf16, #tpu.memory_space<vmem>>, vector<128x128xbf16>
    tpu.vector_store %arg3[%c0_3, %c0_4], %3 {strides = array<i32>} : memref<128x128xbf16, #tpu.memory_space<vmem>>, vector<128x128xbf16>,
    return
  }
  func.func @transform_0(%arg0: i32) -> (i32, i32) {
    %c0_i32 = arith.constant 0 : i32
    %c0_i32_0 = arith.constant 0 : i32
    return %arg0, %c0_i32 : i32, i32
  }
  func.func @transform_1(%arg0: i32) -> (i32, i32) {
    %c0_i32 = arith.constant 0 : i32
    %c0_i32_0 = arith.constant 0 : i32
    %c0_i32_1 = arith.constant 0 : i32
    return %c0_i32, %c0_i32_0 : i32, i32
  }
  func.func @transform_2(%arg0: i32) -> (i32, i32) {
    %c0_i32 = arith.constant 0 : i32
    %c0_i32_0 = arith.constant 0 : i32
    return %arg0, %c0_i32 : i32, i32
  }
}

module attributes {stable_mosaic.version = 11 : i64} {
  func.func @kernel(%arg0: i32, %arg1: i32, %arg2: memref<128x256xbf16, #tpu.memory_space<vmem>>, %arg3: memref<256x128xbf16, #tpu.memory_space<vmem>>, %arg4: memref<128x128xf32, #tpu.memory_space<vmem>>, %arg5: memref<1x128xf32, #tpu.memory_space<vmem>>, %arg6: memref<128x128xf32, #tpu.memory_space<vmem>>) attributes {dimension_semantics = [#tpu.dimension_semantics<parallel>, #tpu.dimension_semantics<arbitrary>], iteration_bounds = array<i64: 2, 1>, scalar_prefetch = 0 : i64, scratch_operands = 0 : i64, tpu.core_type = #tpu.core_type<tc>, window_params = [{transform_indices = @transform_0, window_bounds = array<i64: 128, 256>}, {pipeline_mode = #tpu.pipeline_mode<synchronous>, transform_indices = @transform_1, window_bounds = array<i64: 256, 128>}, {transform_indices = @transform_2, window_bounds = array<i64: 128, 128>}, {pipeline_mode = #tpu.pipeline_mode<synchronous>, transform_indices = @transform_3, window_bounds = array<i64: 1, 128>}, {transform_indices = @transform_4, window_bounds = array<i64: 128, 128>}]} {
    %c0_i32 = arith.constant 0 : i32
    %0 = arith.cmpi eq, %arg1, %c0_i32 : i32
    %1 = arith.extui %0 : i1 to i32
    %c0_i32_0 = arith.constant 0 : i32
    %2 = arith.cmpi ne, %1, %c0_i32_0 : i32
    scf.if %2 {
      %c0_9 = arith.constant 0 : index
      %c0_10 = arith.constant 0 : index
      %15 = vector.load %arg4[%c0_9, %c0_10] : memref<128x128xf32, #tpu.memory_space<vmem>>, vector<128x128xf32>
      %c0_11 = arith.constant 0 : index
      %c0_12 = arith.constant 0 : index
      %16 = vector.load %arg5[%c0_11, %c0_12] : memref<1x128xf32, #tpu.memory_space<vmem>>, vector<1x128xf32>
      %17 = vector.broadcast %16 : vector<1x128xf32> to vector<128x128xf32>
      %18 = arith.addf %17, %15 : vector<128x128xf32>
      %c0_13 = arith.constant 0 : index
      %c0_14 = arith.constant 0 : index
      %19 = vector.load %arg6[%c0_13, %c0_14] : memref<128x128xf32, #tpu.memory_space<vmem>>, vector<128x128xf32>
      tpu.vector_store %arg6[%c0_13, %c0_14], %18 {strides = array<i32>} : memref<128x128xf32, #tpu.memory_space<vmem>>, vector<128x128xf32>,
    } else {
    }
    %c256_i32 = arith.constant 256 : i32
    %3 = arith.muli %arg1, %c256_i32 : i32
    %4 = tpu.assume_multiple %3, 256 : i32
    %5 = arith.index_cast %4 : i32 to index
    %c0 = arith.constant 0 : index
    %6 = vector.load %arg3[%5, %c0] : memref<256x128xbf16, #tpu.memory_space<vmem>>, vector<256x128xbf16>
    %c0_1 = arith.constant 0 : index
    %c0_2 = arith.constant 0 : index
    %7 = vector.load %arg6[%c0_1, %c0_2] : memref<128x128xf32, #tpu.memory_space<vmem>>, vector<128x128xf32>
    %c0_3 = arith.constant 0 : index
    %c0_4 = arith.constant 0 : index
    %8 = vector.load %arg2[%c0_3, %c0_4] : memref<128x256xbf16, #tpu.memory_space<vmem>>, vector<128x256xbf16>
    %cst = arith.constant dense<0.000000e+00> : vector<128x128xf32>
    %9 = tpu.matmul %8, %6, %cst {dimension_numbers = #tpu.dot_dimension_numbers<[1], [0], [0], [1], [0, 0, 1, 1], [], []>} : vector<128x256xbf16>, vector<256x128xbf16>, vector<128x128xf32> -> vector<128x128xf32>
    %10 = arith.addf %7, %9 : vector<128x128xf32>
    %c0_5 = arith.constant 0 : index
    %c0_6 = arith.constant 0 : index
    %11 = vector.load %arg6[%c0_5, %c0_6] : memref<128x128xf32, #tpu.memory_space<vmem>>, vector<128x128xf32>
    tpu.vector_store %arg6[%c0_5, %c0_6], %10 {strides = array<i32>} : memref<128x128xf32, #tpu.memory_space<vmem>>, vector<128x128xf32>,
    %c0_i32_7 = arith.constant 0 : i32
    %12 = arith.cmpi eq, %arg1, %c0_i32_7 : i32
    %13 = arith.extui %12 : i1 to i32
    %c0_i32_8 = arith.constant 0 : i32
    %14 = arith.cmpi ne, %13, %c0_i32_8 : i32
    scf.if %14 {
      %c0_9 = arith.constant 0 : index
      %c0_10 = arith.constant 0 : index
      %15 = vector.load %arg6[%c0_9, %c0_10] : memref<128x128xf32, #tpu.memory_space<vmem>>, vector<128x128xf32>
      %cst_11 = arith.constant 0.000000e+00 : f32
      %16 = vector.broadcast %cst_11 : f32 to vector<128x128xf32>
      %17 = arith.maximumf %15, %16 : vector<128x128xf32>
      %c0_12 = arith.constant 0 : index
      %c0_13 = arith.constant 0 : index
      %18 = vector.load %arg6[%c0_12, %c0_13] : memref<128x128xf32, #tpu.memory_space<vmem>>, vector<128x128xf32>
      tpu.vector_store %arg6[%c0_12, %c0_13], %17 {strides = array<i32>} : memref<128x128xf32, #tpu.memory_space<vmem>>, vector<128x128xf32>,
    } else {
    }
    return
  }
  func.func @transform_0(%arg0: i32, %arg1: i32) -> (i32, i32) {
    %c0_i32 = arith.constant 0 : i32
    return %arg0, %arg1 : i32, i32
  }
  func.func @transform_1(%arg0: i32, %arg1: i32) -> (i32, i32) {
    %c0_i32 = arith.constant 0 : i32
    %c0_i32_0 = arith.constant 0 : i32
    %c0_i32_1 = arith.constant 0 : i32
    return %c0_i32, %c0_i32_0 : i32, i32
  }
  func.func @transform_2(%arg0: i32, %arg1: i32) -> (i32, i32) {
    %c0_i32 = arith.constant 0 : i32
    %c0_i32_0 = arith.constant 0 : i32
    return %arg0, %c0_i32 : i32, i32
  }
  func.func @transform_3(%arg0: i32, %arg1: i32) -> (i32, i32) {
    %c0_i32 = arith.constant 0 : i32
    %c0_i32_0 = arith.constant 0 : i32
    %c0_i32_1 = arith.constant 0 : i32
    return %c0_i32, %c0_i32_0 : i32, i32
  }
  func.func @transform_4(%arg0: i32, %arg1: i32) -> (i32, i32) {
    %c0_i32 = arith.constant 0 : i32
    %c0_i32_0 = arith.constant 0 : i32
    return %arg0, %c0_i32 : i32, i32
  }
}

</mosaic_0001>

<bundles_post_ra>
// kernel: _gcn_forward.2
= control target key start
LH: loop header
LB: loop body
LE: loop exit
PB: predicated region body
PF: predicated region fallthrough
CT: control target
= control target key end

     0   :  { %s605_s9 = smov 0   ;;  %s653_s0 = inlined_call_operand.vmem [shape: bf16[256,128], index: 0, kind: input, shape index: {}]   ;;  %s654_s1 = inlined_call_operand.vmem [shape: bf16[128,128], index: 1, kind: input, shape index: {}]   ;;  %s655_s2 = inlined_call_operand.vmem [shape: bf16[256,128], index: 2, kind: output, shape index: {}]  }
   0x1 LB: > { %s412_s10 = sadd.s32 4294967295, %s588_s9   ;;  %p416_p0 = scmp.ge.s32.totalorder %s588_s9, 1  ;;  %s588_s9 = sphi %s605_s9, %s12_s9  }
   0x2   : > { %p113_p1 = scmp.lt.s32.totalorder %s588_s9, 3 }
   0x4   : > { %p114_p2 = pnand %p416_p0, %p113_p1 }
   0x5   : > { %s417_s19 = sshll.u32 (!%p114_p2), %s412_s10, 4 }
   0x6   : > { %117 = sbr.rel (%p114_p2) target bundleno = 204 (0xcc), region = 28  ;;  %p136_p3 = scmp.lt.s32.totalorder (!%p114_p2), %s417_s19, 31 }
   0xb   : > { %v502_v0 = vld [vmem:[%s654_s1 + $0x38] sm:$0xff]  ;;  %v501_v1 = vld [vmem:[%s654_s1 + $0x30] sm:$0xff]  ;;  %v500_v2 = vld [vmem:[%s654_s1 + $0x28] sm:$0xff]  ;;  %s657_s19 = smov (!%p136_p3, %s417_s19), 31 }
   0xc   : > { %275 = vmatpush.bf16.msra.mxu0 %v502_v0  ;;  %550 = vmatpush.bf16.msra.mxu1 %v502_v0  ;;  %v499_v3 = vld [vmem:[%s654_s1 + $0x20] sm:$0xff]  ;;  %v498_v4 = vld [vmem:[%s654_s1 + $0x18] sm:$0xff]  ;;  %v497_v5 = vld [vmem:[%s654_s1 + $0x10] sm:$0xff]  ;;  %s418_s26 = sshll.u32 %s657_s19, 2 }
   0xd   : > { %551 = vmatpush.bf16.msra.mxu2 %v502_v0  ;;  %552 = vmatpush.bf16.msra.mxu3 %v502_v0  ;;  %v496_v6 = vld [vmem:[%s654_s1 + $0x8] sm:$0xff]  ;;  %v495_v7 = vld [vmem:[%s654_s1] sm:$0xff]  ;;  %s139_s3 = scalar_lea.vmem %s653_s0, %s418_s26  ;;  %s145_s6 = scalar_lea.vmem %s655_s2, %s418_s26 }
   0xe   : > { %v487_v8 = vld [vmem:[%s139_s3] sm:$0xff]  ;;  %v489_v9 = vld [vmem:[%s139_s3 + $0x10] sm:$0xff]  ;;  %v488_v12 = vld [vmem:[%s139_s3 + $0x8] sm:$0xff] }
   0xf   : > { %v491_v10 = vld [vmem:[%s139_s3 + $0x20] sm:$0xff]  ;;  %v493_v11 = vld [vmem:[%s139_s3 + $0x30] sm:$0xff]  ;;  %v490_v13 = vld [vmem:[%s139_s3 + $0x18] sm:$0xff] }
  0x10   : > { %276 = vmatpush.bf16.msra.mxu0 %v501_v1  ;;  %553 = vmatpush.bf16.msra.mxu1 %v501_v1  ;;  %v492_v14 = vld [vmem:[%s139_s3 + $0x28] sm:$0xff]  ;;  %v494_v15 = vld [vmem:[%s139_s3 + $0x38] sm:$0xff] }
  0x11   : > { %554 = vmatpush.bf16.msra.mxu2 %v501_v1  ;;  %555 = vmatpush.bf16.msra.mxu3 %v501_v1 }
  0x14   : > { %277 = vmatpush.bf16.msra.mxu0 %v500_v2  ;;  %556 = vmatpush.bf16.msra.mxu1 %v500_v2 }
  0x15   : > { %557 = vmatpush.bf16.msra.mxu2 %v500_v2  ;;  %558 = vmatpush.bf16.msra.mxu3 %v500_v2 }
  0x18   : > { %278 = vmatpush.bf16.msra.mxu0 %v499_v3  ;;  %559 = vmatpush.bf16.msra.mxu1 %v499_v3 }
  0x19   : > { %560 = vmatpush.bf16.msra.mxu2 %v499_v3  ;;  %561 = vmatpush.bf16.msra.mxu3 %v499_v3 }
  0x1c   : > { %279 = vmatpush.bf16.msra.mxu0 %v498_v4  ;;  %562 = vmatpush.bf16.msra.mxu1 %v498_v4 }
  0x1d   : > { %563 = vmatpush.bf16.msra.mxu2 %v498_v4  ;;  %564 = vmatpush.bf16.msra.mxu3 %v498_v4 }
  0x20   : > { %280 = vmatpush.bf16.msra.mxu0 %v497_v5  ;;  %565 = vmatpush.bf16.msra.mxu1 %v497_v5 }
  0x21   : > { %566 = vmatpush.bf16.msra.mxu2 %v497_v5  ;;  %567 = vmatpush.bf16.msra.mxu3 %v497_v5 }
  0x24   : > { %281 = vmatpush.bf16.msra.mxu0 %v496_v6  ;;  %568 = vmatpush.bf16.msra.mxu1 %v496_v6 }
  0x25   : > { %569 = vmatpush.bf16.msra.mxu2 %v496_v6  ;;  %570 = vmatpush.bf16.msra.mxu3 %v496_v6 }
  0x28   : > { %282 = vmatpush.bf16.msra.mxu0 %v495_v7  ;;  %571 = vmatpush.bf16.msra.mxu1 %v495_v7 }
  0x29   : > { %572 = vmatpush.bf16.msra.mxu2 %v495_v7  ;;  %573 = vmatpush.bf16.msra.mxu3 %v495_v7 }
  0x2b   : > { %283 = vmatmul.bf16.vlgmr.msra.gmra.mxu0 %v487_v8  ;;  %293 = vmatmul.bf16.vlgmr.msra.gmra.mxu1 %v489_v9 }
  0x2c   : > { %303 = vmatmul.bf16.vlgmr.msra.gmra.mxu2 %v491_v10  ;;  %313 = vmatmul.bf16.vlgmr.msra.gmra.mxu3 %v493_v11 }
  0x3b   : > { %288 = vmatmul.bf16.gmra.mxu0 %v488_v12  ;;  %298 = vmatmul.bf16.gmra.mxu1 %v490_v13 }
  0x3c   : > { %308 = vmatmul.bf16.gmra.mxu2 %v492_v14  ;;  %318 = vmatmul.bf16.gmra.mxu3 %v494_v15 }
  0xa8   : > { %v284_v16 = vpop.f32.mrf.mxu0  ;;  %v294_v17 = vpop.f32.mrf.mxu1 }
  0xaf   : > { %v304_v18 = vpop.f32.mrf.mxu2  ;;  %v314_v19 = vpop.f32.mrf.mxu3 }
  0xb0   : > { %v286_v20 = vpop.f32.mrf.mxu0  ;;  %v296_v21 = vpop.f32.mrf.mxu1 }
  0xb1   : > { %v506_v22 = vpack.c.bf16 %v286_v20, %v284_v16  ;;  %v516_v23 = vpack.c.bf16 %v296_v21, %v294_v17 }
  0xb3   : > { %507 = vst [vmem:[%s145_s6] sm:$0xff] %v506_v22  }
  0xb4   : > { %544 = vst [vmem:[%s145_s6 + $0x10] sm:$0xff] %v516_v23  }
  0xb7   : > { %v306_v24 = vpop.f32.mrf.mxu2  ;;  %v316_v25 = vpop.f32.mrf.mxu3 }
  0xb8   : > { %v526_v26 = vpack.c.bf16 %v306_v24, %v304_v18  ;;  %v536_v27 = vpack.c.bf16 %v316_v25, %v314_v19  ;;  %v289_v28 = vpop.f32.mrf.mxu0  ;;  %v299_v29 = vpop.f32.mrf.mxu1 }
  0xba   : > { %546 = vst [vmem:[%s145_s6 + $0x20] sm:$0xff] %v526_v26  }
  0xbb   : > { %548 = vst [vmem:[%s145_s6 + $0x30] sm:$0xff] %v536_v27  }
  0xbf   : > { %v309_v30 = vpop.f32.mrf.mxu2  ;;  %v319_v31 = vpop.f32.mrf.mxu3 }
  0xc0   : > { %v291_v32 = vpop.f32.mrf.mxu0  ;;  %v301_v33 = vpop.f32.mrf.mxu1 }
  0xc1   : > { %v511_v34 = vpack.c.bf16 %v291_v32, %v289_v28  ;;  %v521_v35 = vpack.c.bf16 %v301_v33, %v299_v29 }
  0xc3   : > { %543 = vst [vmem:[%s145_s6 + $0x8] sm:$0xff] %v511_v34  }
  0xc4   : > { %545 = vst [vmem:[%s145_s6 + $0x18] sm:$0xff] %v521_v35  }
  0xc7   : > { %v311_v36 = vpop.f32.mrf.mxu2  ;;  %v321_v37 = vpop.f32.mrf.mxu3 }
  0xc8   : > { %v531_v38 = vpack.c.bf16 %v311_v36, %v309_v30  ;;  %v541_v39 = vpack.c.bf16 %v321_v37, %v319_v31 }
  0xca   : > { %547 = vst [vmem:[%s145_s6 + $0x28] sm:$0xff] %v531_v38  }
  0xcb   : > { %549 = vst [vmem:[%s145_s6 + $0x38] sm:$0xff] %v541_v39  }
  0xcc PF: > { %s12_s9 = sadd.s32 1, %s588_s9  }
  0xcd   : > { %p9_p4 = scmp.ge.s32.totalorder %s12_s9, 4  }
  0xcf   :  { %11 = sbr.rel (!%p9_p4) target bundleno = 1 (0x1), region = 58 }

// kernel: _gcn_forward.3
= control target key start
LH: loop header
LB: loop body
LE: loop exit
PB: predicated region body
PF: predicated region fallthrough
CT: control target
= control target key end

     0   :  { %s1086_s15 = smov 0   ;;  %s1088_s16 = smov 0   ;;  %s1269_s0 = inlined_call_operand.vmem [shape: bf16[256,256], index: 0, kind: input, shape index: {}]   ;;  %s1270_s1 = inlined_call_operand.vmem [shape: bf16[256,128], index: 1, kind: input, shape index: {}]   ;;  %s1271_s2 = inlined_call_operand.vmem [shape: f32[256,128], index: 2, kind: input, shape index: {}]   ;;  %s1272_s3 = inlined_call_operand.vmem [shape: f32[1,128], index: 3, kind: input, shape index: {}]   ;;  %s1273_s4 = inlined_call_operand.vmem [shape: f32[256,128], index: 4, kind: output, shape index: {}]  }
   0x1   :  { %s1090_s17 = smov 0  }
   0x2 LB: > { %s26_s18 = sadd.s32 1, %s1055_s16  ;;  %p825_p0 = scmp.ge.s32.totalorder %s1059_s17, 1  ;;  %s1059_s17 = sphi %s1090_s17, %s14_s17   ;;  %s1055_s16 = sphi %s1088_s16, %s1275_s16   ;;  %s1051_s15 = sphi %s1086_s15, %s1274_s15  }
   0x3   : > { %p28_p1 = scmp.ge.s32.totalorder %s26_s18, 2  ;;  %p194_p2 = scmp.lt.s32.totalorder %s1059_s17, 3 }
   0x5   : > { %s1277_s18 = smov (%p28_p1, %s26_s18), 0  ;;  %p195_p3 = pnand %p825_p0, %p194_p2 }
   0x6   : > { %s826_s5 = sshll.u32 (!%p195_p3), %s1051_s15, 4 }
   0x7   : > { %198 = sbr.rel (%p195_p3) target bundleno = 240 (0xf0), region = 36  ;;  %p232_p4 = scmp.lt.s32.totalorder (!%p195_p3), %s826_s5, 31 }
   0xc   : > { %v971_v0 = vld [vmem:[%s1270_s1 + $0x38] sm:$0xff]  ;;  %v970_v2 = vld [vmem:[%s1270_s1 + $0x30] sm:$0xff]  ;;  %v969_v4 = vld [vmem:[%s1270_s1 + $0x28] sm:$0xff]  ;;  %s1279_s5 = smov (!%p232_p4, %s826_s5), 31 }
   0xd   : > { %v979_v1 = vld [vmem:[%s1270_s1 + $0x78] sm:$0xff]  ;;  %555 = vmatpush.bf16.msra.mxu0 %v971_v0  ;;  %996 = vmatpush.bf16.msra.mxu2 %v971_v0  ;;  %v978_v3 = vld [vmem:[%s1270_s1 + $0x70] sm:$0xff]  ;;  %v977_v5 = vld [vmem:[%s1270_s1 + $0x68] sm:$0xff]  ;;  %s1143_s21 = sshll.u32 %s1279_s5, 3 }
   0xe   : > { %604 = vmatpush.bf16.msra.mxu1 %v979_v1  ;;  %1004 = vmatpush.bf16.msra.mxu3 %v979_v1  ;;  %v968_v6 = vld [vmem:[%s1270_s1 + $0x20] sm:$0xff]  ;;  %v967_v8 = vld [vmem:[%s1270_s1 + $0x18] sm:$0xff]  ;;  %v966_v10 = vld [vmem:[%s1270_s1 + $0x10] sm:$0xff]  ;;  %s1152_s26 = scalar_lea.vmem %s1269_s0, %s1143_s21  ;;  %s1199_s9 = scalar_lea.vmem %s1271_s2, %s1143_s21 }
   0xf   : > { %v976_v7 = vld [vmem:[%s1270_s1 + $0x60] sm:$0xff]  ;;  %v975_v9 = vld [vmem:[%s1270_s1 + $0x58] sm:$0xff]  ;;  %v974_v11 = vld [vmem:[%s1270_s1 + $0x50] sm:$0xff]  ;;  %s1213_s14 = scalar_lea.vmem %s1273_s4, %s1143_s21 }
  0x10   : > { %v965_v12 = vld [vmem:[%s1270_s1 + $0x8] sm:$0xff]  ;;  %v964_v14 = vld [vmem:[%s1270_s1] sm:$0xff]  ;;  %v843_v28 = vld [vmem:[%s1152_s26 + $0x10] sm:$0xf] }
  0x11   : > { %556 = vmatpush.bf16.msra.mxu0 %v970_v2  ;;  %997 = vmatpush.bf16.msra.mxu2 %v970_v2  ;;  %v973_v13 = vld [vmem:[%s1270_s1 + $0x48] sm:$0xff]  ;;  %v972_v15 = vld [vmem:[%s1270_s1 + $0x40] sm:$0xff]  ;;  %v983_v29 = vld [vmem:[%s1152_s26 + $0x14] sm:$0xf0] }
  0x12   : > { %605 = vmatpush.bf16.msra.mxu1 %v978_v3  ;;  %1005 = vmatpush.bf16.msra.mxu3 %v978_v3  ;;  %v835_v16 = vld [vmem:[%s1152_s26] sm:$0xf]  ;;  %v981_v17 = vld [vmem:[%s1152_s26 + $0x4] sm:$0xf0]  ;;  %v980_v20 = vld [vmem:[%s1152_s26 + $0x4] sm:$0xf]  ;;  %v844_v36 = vor.u32 %v983_v29, %v843_v28 }
  0x13   : > { %v867_v18 = vld [vmem:[%s1152_s26 + $0x40] sm:$0xf]  ;;  %v989_v19 = vld [vmem:[%s1152_s26 + $0x44] sm:$0xf0]  ;;  %v837_v21 = vld [vmem:[%s1152_s26 + $0x8] sm:$0xf0]  ;;  %v836_v24 = vor.u32 %v981_v17, %v835_v16 }
  0x14   : > { %v988_v22 = vld [vmem:[%s1152_s26 + $0x44] sm:$0xf]  ;;  %v869_v23 = vld [vmem:[%s1152_s26 + $0x48] sm:$0xf0]  ;;  %v868_v25 = vor.u32 %v989_v19, %v867_v18  ;;  %v840_v26 = vor.u32 %v980_v20, %v837_v21  ;;  %v875_v30 = vld [vmem:[%s1152_s26 + $0x50] sm:$0xf] }
  0x15   : > { %557 = vmatpush.bf16.msra.mxu0 %v969_v4  ;;  %998 = vmatpush.bf16.msra.mxu2 %v969_v4  ;;  %v872_v27 = vor.u32 %v988_v22, %v869_v23  ;;  %v991_v31 = vld [vmem:[%s1152_s26 + $0x54] sm:$0xf0]  ;;  %v982_v32 = vld [vmem:[%s1152_s26 + $0x14] sm:$0xf]  ;;  %v845_v33 = vld [vmem:[%s1152_s26 + $0x18] sm:$0xf0] }
  0x16   : > { %606 = vmatpush.bf16.msra.mxu1 %v977_v5  ;;  %1006 = vmatpush.bf16.msra.mxu3 %v977_v5  ;;  %v990_v34 = vld [vmem:[%s1152_s26 + $0x54] sm:$0xf]  ;;  %v877_v35 = vld [vmem:[%s1152_s26 + $0x58] sm:$0xf0]  ;;  %v876_v37 = vor.u32 %v991_v31, %v875_v30  ;;  %v848_v38 = vor.u32 %v982_v32, %v845_v33  ;;  %v851_v40 = vld [vmem:[%s1152_s26 + $0x20] sm:$0xf] }
  0x17   : > { %v880_v39 = vor.u32 %v990_v34, %v877_v35  ;;  %v985_v41 = vld [vmem:[%s1152_s26 + $0x24] sm:$0xf0]  ;;  %v883_v42 = vld [vmem:[%s1152_s26 + $0x60] sm:$0xf]  ;;  %v984_v44 = vld [vmem:[%s1152_s26 + $0x24] sm:$0xf] }
  0x18   : > { %v993_v43 = vld [vmem:[%s1152_s26 + $0x64] sm:$0xf0]  ;;  %v853_v45 = vld [vmem:[%s1152_s26 + $0x28] sm:$0xf0]  ;;  %v992_v46 = vld [vmem:[%s1152_s26 + $0x64] sm:$0xf]  ;;  %v852_v48 = vor.u32 %v985_v41, %v851_v40 }
  0x19   : > { %558 = vmatpush.bf16.msra.mxu0 %v968_v6  ;;  %999 = vmatpush.bf16.msra.mxu2 %v968_v6  ;;  %v885_v47 = vld [vmem:[%s1152_s26 + $0x68] sm:$0xf0]  ;;  %v884_v49 = vor.u32 %v993_v43, %v883_v42  ;;  %v856_v50 = vor.u32 %v984_v44, %v853_v45  ;;  %v859_v52 = vld [vmem:[%s1152_s26 + $0x30] sm:$0xf]  ;;  %v987_v53 = vld [vmem:[%s1152_s26 + $0x34] sm:$0xf0] }
  0x1a   : > { %607 = vmatpush.bf16.msra.mxu1 %v976_v7  ;;  %1007 = vmatpush.bf16.msra.mxu3 %v976_v7  ;;  %v888_v51 = vor.u32 %v992_v46, %v885_v47  ;;  %v891_v54 = vld [vmem:[%s1152_s26 + $0x70] sm:$0xf]  ;;  %v995_v55 = vld [vmem:[%s1152_s26 + $0x74] sm:$0xf0]  ;;  %v986_v56 = vld [vmem:[%s1152_s26 + $0x34] sm:$0xf]  ;;  %v860_v60 = vor.u32 %v987_v53, %v859_v52 }
  0x1b   : > { %v861_v57 = vld [vmem:[%s1152_s26 + $0x38] sm:$0xf0]  ;;  %v994_v58 = vld [vmem:[%s1152_s26 + $0x74] sm:$0xf]  ;;  %v892_v61 = vor.u32 %v995_v55, %v891_v54  ;;  %v1204_v0 = vld [vmem:[%s1272_s3] ss:$0 sm:$0xff] }
  0x1c   : > { %v893_v59 = vld [vmem:[%s1152_s26 + $0x78] sm:$0xf0]  ;;  %v864_v62 = vor.u32 %v986_v56, %v861_v57  ;;  %v258_v1 = vld [vmem:[%s1199_s9] sm:$0xff]  ;;  %v267_v19 = vld [vmem:[%s1199_s9 + $0x48] sm:$0xff] }
  0x1d   : > { %559 = vmatpush.bf16.msra.mxu0 %v967_v8  ;;  %1000 = vmatpush.bf16.msra.mxu2 %v967_v8  ;;  %v896_v63 = vor.u32 %v994_v58, %v893_v59  ;;  %v278_v3 = vadd.f32 %v1204_v0, %v258_v1  ;;  %v266_v6 = vld [vmem:[%s1199_s9 + $0x40] sm:$0xff]  ;;  %v259_v8 = vld [vmem:[%s1199_s9 + $0x8] sm:$0xff]  ;;  %v260_v22 = vld [vmem:[%s1199_s9 + $0x10] sm:$0xff] }
  0x1e   : > { %608 = vmatpush.bf16.msra.mxu1 %v975_v9  ;;  %1008 = vmatpush.bf16.msra.mxu3 %v975_v9  ;;  %v280_v29 = vadd.f32 %v1204_v0, %v260_v22  ;;  %v268_v33 = vld [vmem:[%s1199_s9 + $0x50] sm:$0xff]  ;;  %v269_v47 = vld [vmem:[%s1199_s9 + $0x58] sm:$0xff]  ;;  %v263_v1 = vld [vmem:[%s1199_s9 + $0x28] sm:$0xff] }
  0x1f   : > { %v289_v53 = vadd.f32 %v1204_v0, %v269_v47 }
  0x21   : > { %560 = vmatpush.bf16.msra.mxu0 %v966_v10  ;;  %1001 = vmatpush.bf16.msra.mxu2 %v966_v10 }
  0x22   : > { %609 = vmatpush.bf16.msra.mxu1 %v974_v11  ;;  %1009 = vmatpush.bf16.msra.mxu3 %v974_v11  ;;  %v286_v11 = vadd.f32 %v1204_v0, %v266_v6 }
  0x25   : > { %561 = vmatpush.bf16.msra.mxu0 %v965_v12  ;;  %1002 = vmatpush.bf16.msra.mxu2 %v965_v12 }
  0x26   : > { %610 = vmatpush.bf16.msra.mxu1 %v973_v13  ;;  %1010 = vmatpush.bf16.msra.mxu3 %v973_v13 }
  0x29   : > { %562 = vmatpush.bf16.msra.mxu0 %v964_v14  ;;  %1003 = vmatpush.bf16.msra.mxu2 %v964_v14 }
  0x2a   : > { %611 = vmatpush.bf16.msra.mxu1 %v972_v15  ;;  %1011 = vmatpush.bf16.msra.mxu3 %v972_v15  ;;  %v279_v15 = vadd.f32 %v1204_v0, %v259_v8  ;;  %v283_v8 = vadd.f32 %v1204_v0, %v263_v1 }
  0x2c   : > { %563 = vmatmul.bf16.vlgmr.msra.gmra.mxu0 %v836_v24  ;;  %583 = vmatmul.bf16.vlgmr.msra.gmra.mxu2 %v868_v25  ;;  %v287_v25 = vadd.f32 %v1204_v0, %v267_v19 }
  0x2d   : > { %612 = vmatmul.bf16.vlgmr.msra.gmra.mxu1 %v840_v26  ;;  %632 = vmatmul.bf16.vlgmr.msra.gmra.mxu3 %v872_v27 }
  0x3c   : > { %568 = vmatmul.bf16.gmra.mxu0 %v844_v36  ;;  %588 = vmatmul.bf16.gmra.mxu2 %v876_v37  ;;  %v261_v36 = vld [vmem:[%s1199_s9 + $0x18] sm:$0xff] }
  0x3d   : > { %617 = vmatmul.bf16.gmra.mxu1 %v848_v38  ;;  %637 = vmatmul.bf16.gmra.mxu3 %v880_v39  ;;  %v288_v39 = vadd.f32 %v1204_v0, %v268_v33  ;;  %v281_v43 = vadd.f32 %v1204_v0, %v261_v36 }
  0x4c   : > { %573 = vmatmul.bf16.gmra.mxu0 %v852_v48  ;;  %593 = vmatmul.bf16.gmra.mxu2 %v884_v49 }
  0x4d   : > { %622 = vmatmul.bf16.gmra.mxu1 %v856_v50  ;;  %642 = vmatmul.bf16.gmra.mxu3 %v888_v51  ;;  %v262_v50 = vld [vmem:[%s1199_s9 + $0x20] sm:$0xff] }
  0x4e   : > { %v282_v57 = vadd.f32 %v1204_v0, %v262_v50 }
  0x5c   : > { %578 = vmatmul.bf16.gmra.mxu0 %v860_v60  ;;  %598 = vmatmul.bf16.gmra.mxu2 %v892_v61  ;;  %v270_v61 = vld [vmem:[%s1199_s9 + $0x60] sm:$0xff] }
  0x5d   : > { %627 = vmatmul.bf16.gmra.mxu1 %v864_v62  ;;  %647 = vmatmul.bf16.gmra.mxu3 %v896_v63 }
  0xa9   : > { %v564_v2 = vpop.f32.mrf.mxu0 }
  0xaa   : > { %v613_v4 = vpop.f32.mrf.mxu1 }
  0xab   : > { %v614_v5 = vadd.f32 %v613_v4, %v564_v2  ;;  %v290_v4 = vadd.f32 %v1204_v0, %v270_v61 }
  0xad   : > { %v653_v7 = vadd.f32 %v614_v5, %v278_v3 }
  0xaf   : > { %v704_v9 = vmax.f32 %v653_v7, 0.0  ;;  %v584_v10 = vpop.f32.mrf.mxu2 }
  0xb0   : > { %v633_v12 = vpop.f32.mrf.mxu3 }
  0xb1   : > { %720 = vst [vmem:[%s1213_s14] sm:$0xff] %v704_v9  ;;  %v634_v13 = vadd.f32 %v633_v12, %v584_v10  ;;  %v566_v14 = vpop.f32.mrf.mxu0  ;;  %v271_v12 = vld [vmem:[%s1199_s9 + $0x68] sm:$0xff] }
  0xb2   : > { %v615_v16 = vpop.f32.mrf.mxu1 }
  0xb3   : > { %v661_v17 = vadd.f32 %v634_v13, %v286_v11  ;;  %v616_v18 = vadd.f32 %v615_v16, %v566_v14 }
  0xb5   : > { %v712_v20 = vmax.f32 %v661_v17, 0.0  ;;  %v654_v21 = vadd.f32 %v616_v18, %v279_v15  ;;  %v264_v15 = vld [vmem:[%s1199_s9 + $0x30] sm:$0xff]  ;;  %v291_v18 = vadd.f32 %v1204_v0, %v271_v12 }
  0xb6   : > { %v284_v22 = vadd.f32 %v1204_v0, %v264_v15 }
  0xb7   : > { %728 = vst [vmem:[%s1213_s14 + $0x40] sm:$0xff] %v712_v20  ;;  %v705_v23 = vmax.f32 %v654_v21, 0.0  ;;  %v586_v24 = vpop.f32.mrf.mxu2 }
  0xb8   : > { %v635_v26 = vpop.f32.mrf.mxu3 }
  0xb9   : > { %721 = vst [vmem:[%s1213_s14 + $0x8] sm:$0xff] %v705_v23  ;;  %v636_v27 = vadd.f32 %v635_v26, %v586_v24  ;;  %v569_v28 = vpop.f32.mrf.mxu0  ;;  %v272_v26 = vld [vmem:[%s1199_s9 + $0x70] sm:$0xff] }
  0xba   : > { %v618_v30 = vpop.f32.mrf.mxu1 }
  0xbb   : > { %v662_v31 = vadd.f32 %v636_v27, %v287_v25  ;;  %v619_v32 = vadd.f32 %v618_v30, %v569_v28 }
  0xbd   : > { %v713_v34 = vmax.f32 %v662_v31, 0.0  ;;  %v655_v35 = vadd.f32 %v619_v32, %v280_v29  ;;  %v265_v29 = vld [vmem:[%s1199_s9 + $0x38] sm:$0xff]  ;;  %v292_v32 = vadd.f32 %v1204_v0, %v272_v26 }
  0xbe   : > { %v285_v36 = vadd.f32 %v1204_v0, %v265_v29 }
  0xbf   : > { %729 = vst [vmem:[%s1213_s14 + $0x48] sm:$0xff] %v713_v34  ;;  %v706_v37 = vmax.f32 %v655_v35, 0.0  ;;  %v589_v38 = vpop.f32.mrf.mxu2 }
  0xc0   : > { %v638_v40 = vpop.f32.mrf.mxu3 }
  0xc1   : > { %722 = vst [vmem:[%s1213_s14 + $0x10] sm:$0xff] %v706_v37  ;;  %v639_v41 = vadd.f32 %v638_v40, %v589_v38  ;;  %v571_v42 = vpop.f32.mrf.mxu0  ;;  %v273_v40 = vld [vmem:[%s1199_s9 + $0x78] sm:$0xff] }
  0xc2   : > { %v620_v44 = vpop.f32.mrf.mxu1 }
  0xc3   : > { %v663_v45 = vadd.f32 %v639_v41, %v288_v39  ;;  %v621_v46 = vadd.f32 %v620_v44, %v571_v42 }
  0xc5   : > { %v714_v48 = vmax.f32 %v663_v45, 0.0  ;;  %v656_v49 = vadd.f32 %v621_v46, %v281_v43  ;;  %v293_v45 = vadd.f32 %v1204_v0, %v273_v40 }
  0xc7   : > { %730 = vst [vmem:[%s1213_s14 + $0x50] sm:$0xff] %v714_v48  ;;  %v707_v51 = vmax.f32 %v656_v49, 0.0  ;;  %v591_v52 = vpop.f32.mrf.mxu2 }
  0xc8   : > { %v640_v54 = vpop.f32.mrf.mxu3 }
  0xc9   : > { %723 = vst [vmem:[%s1213_s14 + $0x18] sm:$0xff] %v707_v51  ;;  %v641_v55 = vadd.f32 %v640_v54, %v591_v52  ;;  %v574_v56 = vpop.f32.mrf.mxu0 }
  0xca   : > { %v623_v58 = vpop.f32.mrf.mxu1 }
  0xcb   : > { %v664_v59 = vadd.f32 %v641_v55, %v289_v53  ;;  %v624_v60 = vadd.f32 %v623_v58, %v574_v56 }
  0xcd   : > { %v715_v62 = vmax.f32 %v664_v59, 0.0  ;;  %v657_v63 = vadd.f32 %v624_v60, %v282_v57 }
  0xcf   : > { %731 = vst [vmem:[%s1213_s14 + $0x58] sm:$0xff] %v715_v62  ;;  %v708_v2 = vmax.f32 %v657_v63, 0.0  ;;  %v594_v3 = vpop.f32.mrf.mxu2 }
  0xd0   : > { %v643_v5 = vpop.f32.mrf.mxu3 }
  0xd1   : > { %724 = vst [vmem:[%s1213_s14 + $0x20] sm:$0xff] %v708_v2  ;;  %v644_v6 = vadd.f32 %v643_v5, %v594_v3  ;;  %v576_v7 = vpop.f32.mrf.mxu0 }
  0xd2   : > { %v625_v9 = vpop.f32.mrf.mxu1 }
  0xd3   : > { %v665_v10 = vadd.f32 %v644_v6, %v290_v4  ;;  %v626_v11 = vadd.f32 %v625_v9, %v576_v7 }
  0xd5   : > { %v716_v13 = vmax.f32 %v665_v10, 0.0  ;;  %v658_v14 = vadd.f32 %v626_v11, %v283_v8 }
  0xd7   : > { %732 = vst [vmem:[%s1213_s14 + $0x60] sm:$0xff] %v716_v13  ;;  %v709_v16 = vmax.f32 %v658_v14, 0.0  ;;  %v596_v17 = vpop.f32.mrf.mxu2 }
  0xd8   : > { %v645_v19 = vpop.f32.mrf.mxu3 }
  0xd9   : > { %725 = vst [vmem:[%s1213_s14 + $0x28] sm:$0xff] %v709_v16  ;;  %v646_v20 = vadd.f32 %v645_v19, %v596_v17  ;;  %v579_v21 = vpop.f32.mrf.mxu0 }
  0xda   : > { %v628_v23 = vpop.f32.mrf.mxu1 }
  0xdb   : > { %v666_v24 = vadd.f32 %v646_v20, %v291_v18  ;;  %v629_v25 = vadd.f32 %v628_v23, %v579_v21 }
  0xdd   : > { %v717_v27 = vmax.f32 %v666_v24, 0.0  ;;  %v659_v28 = vadd.f32 %v629_v25, %v284_v22 }
  0xdf   : > { %733 = vst [vmem:[%s1213_s14 + $0x68] sm:$0xff] %v717_v27  ;;  %v710_v30 = vmax.f32 %v659_v28, 0.0  ;;  %v599_v31 = vpop.f32.mrf.mxu2 }
  0xe0   : > { %v648_v33 = vpop.f32.mrf.mxu3 }
  0xe1   : > { %726 = vst [vmem:[%s1213_s14 + $0x30] sm:$0xff] %v710_v30  ;;  %v649_v34 = vadd.f32 %v648_v33, %v599_v31  ;;  %v581_v35 = vpop.f32.mrf.mxu0 }
  0xe2   : > { %v630_v37 = vpop.f32.mrf.mxu1 }
  0xe3   : > { %v667_v38 = vadd.f32 %v649_v34, %v292_v32  ;;  %v631_v39 = vadd.f32 %v630_v37, %v581_v35 }
  0xe5   : > { %v718_v41 = vmax.f32 %v667_v38, 0.0  ;;  %v660_v42 = vadd.f32 %v631_v39, %v285_v36 }
  0xe7   : > { %734 = vst [vmem:[%s1213_s14 + $0x70] sm:$0xff] %v718_v41  ;;  %v711_v43 = vmax.f32 %v660_v42, 0.0  ;;  %v601_v44 = vpop.f32.mrf.mxu2 }
  0xe8   : > { %v650_v46 = vpop.f32.mrf.mxu3 }
  0xe9   : > { %727 = vst [vmem:[%s1213_s14 + $0x38] sm:$0xff] %v711_v43  ;;  %v651_v47 = vadd.f32 %v650_v46, %v601_v44 }
  0xeb   : > { %v668_v48 = vadd.f32 %v651_v47, %v293_v45 }
  0xed   : > { %v719_v49 = vmax.f32 %v668_v48, 0.0 }
  0xef   : > { %735 = vst [vmem:[%s1213_s14 + $0x78] sm:$0xff] %v719_v49 }
  0xf0 PF: > { %s14_s17 = sadd.s32 1, %s1059_s17   ;;  %s1274_s15 = smov %s1055_s16 }
  0xf1   : > { %p11_p5 = scmp.ge.s32.totalorder %s14_s17, 4   ;;  %s1275_s16 = smov %s1277_s18 }
  0xf3   :  { %13 = sbr.rel (!%p11_p5) target bundleno = 2 (0x2), region = 78 }

</bundles_post_ra>
